<compile_context>
chip_gen: v7x
topology: tpu7x:2x2x1
jax: 0.10.0
libtpu: 0.0.40
codegen_flags: <defaults>
</compile_context>

<pallas_src>
import jax
import jax.numpy as jnp
from jax.experimental import pallas as pl
from jax.experimental.pallas import tpu as pltpu

MIN_VALUE = 0.4
MAX_VALUE = 0.5


def _kernel(x_ref, wt_ref, b_ref, o_ref):
    # x_ref : (B, C_in, L)   native layout, no wrapper relayout
    # wt_ref: (C_out, C_in)  transposed ConvTranspose1d weight (k=1 squeezed)
    # b_ref : (C_out, 1)     bias
    # o_ref : (B, C_out, L)  written directly in the module's output layout
    wt = wt_ref[...]
    bias = b_ref[...]

    # Static unroll over the (tiny) batch axis: one small MXU push + VPU
    # clamp/exp + XLU row-reduce per batch element.
    for bi in range(x_ref.shape[0]):
        xb = x_ref[bi]                                           # (C_in, L)
        # pointwise "conv transpose": (C_out, C_in) @ (C_in, L) -> (C_out, L)
        y = jnp.dot(wt, xb, preferred_element_type=jnp.float32) + bias
        # clamp_min then clamp_max
        y = jnp.minimum(jnp.maximum(y, MIN_VALUE), MAX_VALUE)
        # softmax over L.  Values are bounded in [MIN_VALUE, MAX_VALUE], so a
        # constant shift safely replaces the per-row max reduction.
        e = jnp.exp(y - MAX_VALUE)
        s = jnp.sum(e, axis=-1, keepdims=True)                   # (C_out, 1)
        o_ref[bi] = (e * pl.reciprocal(s, approx=True)).astype(o_ref.dtype)


def prepare_params(weight, bias):
    """One-time parameter prep (outside the hot path).

    weight: (C_in, C_out, 1) ConvTranspose1d weight; bias: (C_out,)
    """
    w_t = jnp.transpose(weight[:, :, 0], (1, 0))  # (C_out, C_in)
    b2 = bias.reshape(-1, 1)                      # (C_out, 1)
    return w_t, b2


@jax.jit
def model_forward(x, w_t, b2):
    """x: (B, C_in, L) float32; w_t: (C_out, C_in); b2: (C_out, 1)."""
    B, C_in, L = x.shape
    C_out = w_t.shape[0]

    cost = pl.CostEstimate(
        flops=2 * B * C_out * C_in * L + 6 * B * C_out * L,
        transcendentals=B * C_out * L + B * C_out,
        bytes_accessed=4 * (B * C_in * L + C_out * C_in + C_out + B * C_out * L),
    )

    # Grid-less single invocation: the whole problem is a few KiB, so any grid
    # only adds per-step pipeline overhead.  For production-sized B, use
    # grid=(B,) with dimension_semantics=("parallel",) instead (v7x 2-TC).
    return pl.pallas_call(
        _kernel,
        out_shape=jax.ShapeDtypeStruct((B, C_out, L), x.dtype),
        in_specs=[
            pl.BlockSpec(memory_space=pltpu.MemorySpace.VMEM),
            pl.BlockSpec(memory_space=pltpu.MemorySpace.VMEM),
            pl.BlockSpec(memory_space=pltpu.MemorySpace.VMEM),
        ],
        out_specs=pl.BlockSpec(memory_space=pltpu.MemorySpace.VMEM),
        cost_estimate=cost,
    )(x, w_t, b2)


def reference_forward(x, weight, bias):
    # plain-JAX reference for sanity checking
    w_t = jnp.transpose(weight[:, :, 0], (1, 0))
    y = jnp.einsum("oc,bcl->bol", w_t, x) + bias[None, :, None]
    y = jnp.clip(y, MIN_VALUE, MAX_VALUE)
    return jax.nn.softmax(y, axis=-1)


if __name__ == "__main__":
    key = jax.random.PRNGKey(0)
    k_x, k_w, k_b = jax.random.split(key, 3)

    B, C, L = 2, 10, 8  # batch=2, channels=10 (matches module), length=8
    x = jax.random.normal(k_x, (B, C, L), dtype=jnp.float32)

    # ConvTranspose1d(10, 10, 1): weight shape (in_channels, out_channels, kernel)
    fan = C * 1
    bound = 1.0 / (fan ** 0.5)
    weight = jax.random.uniform(k_w, (C, C, 1), minval=-bound, maxval=bound,
                                dtype=jnp.float32)
    bias = jax.random.uniform(k_b, (C,), minval=-bound, maxval=bound,
                              dtype=jnp.float32)

    w_t, b2 = prepare_params(weight, bias)   # hoisted param prep (one-time)

    out = model_forward(x, w_t, b2)
    out = jax.block_until_ready(out)

    ref = reference_forward(x, weight, bias)
    assert out.shape == (B, C, L)
    # approx reciprocal (EUP) is slightly looser than an exact f32 divide
    assert jnp.allclose(out, ref, atol=5e-4, rtol=1e-3)

    print("KERNEL_OK")
</pallas_src>

<mosaic_0001>
module attributes {stable_mosaic.version = 11 : i64} {
  func.func @_kernel(%arg0: memref<2x10x8xf32, #tpu.memory_space<vmem>>, %arg1: memref<10x10xf32, #tpu.memory_space<vmem>>, %arg2: memref<10x1xf32, #tpu.memory_space<vmem>>, %arg3: memref<2x10x8xf32, #tpu.memory_space<vmem>>) attributes {dimension_semantics = [], scalar_prefetch = 0 : i64, scratch_operands = 0 : i64, tpu.core_type = #tpu.core_type<tc>} {
    %c0 = arith.constant 0 : index
    %c0_0 = arith.constant 0 : index
    %0 = vector.load %arg1[%c0, %c0_0] : memref<10x10xf32, #tpu.memory_space<vmem>>, vector<10x10xf32>
    %c0_1 = arith.constant 0 : index
    %c0_2 = arith.constant 0 : index
    %1 = vector.load %arg2[%c0_1, %c0_2] : memref<10x1xf32, #tpu.memory_space<vmem>>, vector<10x1xf32>
    %c0_3 = arith.constant 0 : index
    %c0_4 = arith.constant 0 : index
    %c0_5 = arith.constant 0 : index
    %2 = vector.load %arg0[%c0_3, %c0_4, %c0_5] : memref<2x10x8xf32, #tpu.memory_space<vmem>>, vector<1x10x8xf32>
    %3 = vector.shape_cast %2 : vector<1x10x8xf32> to vector<10x8xf32>
    %cst = arith.constant dense<0.000000e+00> : vector<10x8xf32>
    %4 = tpu.matmul %0, %3, %cst {dimension_numbers = #tpu.dot_dimension_numbers<[1], [0], [0], [1], [0, 0, 1, 1], [], []>} : vector<10x10xf32>, vector<10x8xf32>, vector<10x8xf32> -> vector<10x8xf32>
    %5 = vector.broadcast %1 : vector<10x1xf32> to vector<10x8xf32>
    %6 = arith.addf %4, %5 : vector<10x8xf32>
    %cst_6 = arith.constant 4.000000e-01 : f32
    %7 = vector.broadcast %cst_6 : f32 to vector<10x8xf32>
    %8 = arith.maximumf %6, %7 : vector<10x8xf32>
    %cst_7 = arith.constant 5.000000e-01 : f32
    %9 = vector.broadcast %cst_7 : f32 to vector<10x8xf32>
    %10 = arith.minimumf %8, %9 : vector<10x8xf32>
    %cst_8 = arith.constant 5.000000e-01 : f32
    %11 = vector.broadcast %cst_8 : f32 to vector<10x8xf32>
    %12 = arith.subf %10, %11 : vector<10x8xf32>
    %13 = math.exp %12 : vector<10x8xf32>
    %cst_9 = arith.constant dense<0.000000e+00> : vector<10xf32>
    %14 = vector.multi_reduction <add>, %13, %cst_9 [1] : vector<10x8xf32> to vector<10xf32>
    %15 = vector.shape_cast %14 : vector<10xf32> to vector<10x1xf32>
    %16 = tpu.reciprocal %15 {approx = true} : vector<10x1xf32> -> vector<10x1xf32>
    %17 = vector.broadcast %16 : vector<10x1xf32> to vector<10x8xf32>
    %18 = arith.mulf %13, %17 : vector<10x8xf32>
    %c0_10 = arith.constant 0 : index
    %c0_11 = arith.constant 0 : index
    %c0_12 = arith.constant 0 : index
    %19 = vector.load %arg3[%c0_10, %c0_11, %c0_12] : memref<2x10x8xf32, #tpu.memory_space<vmem>>, vector<1x10x8xf32>
    %20 = vector.shape_cast %19 : vector<1x10x8xf32> to vector<10x8xf32>
    %21 = vector.shape_cast %18 : vector<10x8xf32> to vector<1x10x8xf32>
    tpu.vector_store %arg3[%c0_10, %c0_11, %c0_12], %21 {strides = array<i32>} : memref<2x10x8xf32, #tpu.memory_space<vmem>>, vector<1x10x8xf32>,
    %c1 = arith.constant 1 : index
    %c0_13 = arith.constant 0 : index
    %c0_14 = arith.constant 0 : index
    %22 = vector.load %arg0[%c1, %c0_13, %c0_14] : memref<2x10x8xf32, #tpu.memory_space<vmem>>, vector<1x10x8xf32>
    %23 = vector.shape_cast %22 : vector<1x10x8xf32> to vector<10x8xf32>
    %cst_15 = arith.constant dense<0.000000e+00> : vector<10x8xf32>
    %24 = tpu.matmul %0, %23, %cst_15 {dimension_numbers = #tpu.dot_dimension_numbers<[1], [0], [0], [1], [0, 0, 1, 1], [], []>} : vector<10x10xf32>, vector<10x8xf32>, vector<10x8xf32> -> vector<10x8xf32>
    %25 = vector.broadcast %1 : vector<10x1xf32> to vector<10x8xf32>
    %26 = arith.addf %24, %25 : vector<10x8xf32>
    %cst_16 = arith.constant 4.000000e-01 : f32
    %27 = vector.broadcast %cst_16 : f32 to vector<10x8xf32>
    %28 = arith.maximumf %26, %27 : vector<10x8xf32>
    %cst_17 = arith.constant 5.000000e-01 : f32
    %29 = vector.broadcast %cst_17 : f32 to vector<10x8xf32>
    %30 = arith.minimumf %28, %29 : vector<10x8xf32>
    %cst_18 = arith.constant 5.000000e-01 : f32
    %31 = vector.broadcast %cst_18 : f32 to vector<10x8xf32>
    %32 = arith.subf %30, %31 : vector<10x8xf32>
    %33 = math.exp %32 : vector<10x8xf32>
    %cst_19 = arith.constant dense<0.000000e+00> : vector<10xf32>
    %34 = vector.multi_reduction <add>, %33, %cst_19 [1] : vector<10x8xf32> to vector<10xf32>
    %35 = vector.shape_cast %34 : vector<10xf32> to vector<10x1xf32>
    %36 = tpu.reciprocal %35 {approx = true} : vector<10x1xf32> -> vector<10x1xf32>
    %37 = vector.broadcast %36 : vector<10x1xf32> to vector<10x8xf32>
    %38 = arith.mulf %33, %37 : vector<10x8xf32>
    %c1_20 = arith.constant 1 : index
    %c0_21 = arith.constant 0 : index
    %c0_22 = arith.constant 0 : index
    %39 = vector.load %arg3[%c1_20, %c0_21, %c0_22] : memref<2x10x8xf32, #tpu.memory_space<vmem>>, vector<1x10x8xf32>
    %40 = vector.shape_cast %39 : vector<1x10x8xf32> to vector<10x8xf32>
    %41 = vector.shape_cast %38 : vector<10x8xf32> to vector<1x10x8xf32>
    tpu.vector_store %arg3[%c1_20, %c0_21, %c0_22], %41 {strides = array<i32>} : memref<2x10x8xf32, #tpu.memory_space<vmem>>, vector<1x10x8xf32>,
    return
  }
}

</mosaic_0001>

<bundles_post_ra>
// kernel: model_forward.1
= control target key start
LH: loop header
LB: loop body
LE: loop exit
PB: predicated region body
PF: predicated region fallthrough
CT: control target
= control target key end

     0   :  { %vm37_vm0 = vcmask 1041408   ;;  %vm30_vm1 = vcmask 80896   ;;  %vm315_vm2 = vmmov 1   ;;  %v316_v3 = vmov 0   ;;  %s397_s0 = inlined_call_operand.vmem [shape: f32[2,10,8], index: 0, kind: input, shape index: {}]   ;;  %s398_s1 = inlined_call_operand.vmem [shape: f32[10,10], index: 1, kind: input, shape index: {}]   ;;  %s399_s2 = inlined_call_operand.vmem [shape: f32[10,1], index: 2, kind: input, shape index: {}]   ;;  %s400_s3 = inlined_call_operand.vmem [shape: f32[2,10,8], index: 3, kind: output, shape index: {}]  }
   0x1   :  { %v18_v0 = vld [vmem:[%s397_s0] sm:$0xff]  ;;  %v19_v1 = vld [vmem:[%s397_s0 + $0x8] sm:$0x3]  ;;  %vm343_vm3 = vmpackc.low %vm37_vm0, %vm315_vm2  ;;  %298 = vset.pattern.permute.xlu0 %v316_v3  ;;  %vm130_vm4 = vcmask 58368   ;;  %vm126_vm5 = vcmask 64512  }
   0x2   :  { %v284_v4 = vpack.c.bf16 %v19_v1, %v18_v0  ;;  %v253_v5 = vld [vmem:[%s397_s0 + $0x10] sm:$0xff]  ;;  %v254_v6 = vld [vmem:[%s397_s0 + $0x18] sm:$0x3]  ;;  %v14_v7 = vld [vmem:[%s398_s1] sm:$0xff] }
   0x3   :  { %v290_v8 = vpack.c.bf16 %v254_v6, %v253_v5  ;;  %274 = vmatprep.mubr.msk.f32.mxu0 %vm30_vm1, %v14_v7  ;;  %281 = vmatprep.mubr.msk.f32.mxu1 %vm30_vm1, %v14_v7  ;;  %v16_v9 = vld [vmem:[%s399_s2] sm:$0xff]  ;;  %v15_v10 = vld [vmem:[%s398_s1 + $0x8] sm:$0x3] }
   0x4   :  { %286 = vmatprep.subr.msk.bf16.mxu0 %vm343_vm3, %v284_v4  ;;  %22 = vperm.xlu0 %298, %v16_v9   ;;  %v17_v11 = vld [vmem:[%s399_s2 + $0x8] sm:$0x3] }
   0x5   :  { %292 = vmatprep.subr.msk.bf16.mxu1 %vm343_vm3, %v290_v8  ;;  %289 = vmatpush3.bf16.msk.msra.mxu0 %vm343_vm3, %v284_v4 }
   0x6   :  { %295 = vmatpush3.bf16.msk.msra.mxu1 %vm343_vm3, %v290_v8 }
   0x8   :  { %275 = vmatmul.mubr.msk.f32.vlgmr.msra.gmra.mrb[0].mxu0 %vm30_vm1, %v15_v10  ;;  %27 = vperm.xlu0 %298, %v17_v11  }
   0x9   :  { %282 = vmatmul.mubr.msk.f32.vlgmr.msra.gmra.mrb[0].mxu1 %vm30_vm1, %v15_v10 }
  0x83   :  { %v23_v12 = vpop.permute.xlu0 %22 }
  0x87   :  { %v28_v13 = vpop.permute.xlu0 %27 }
  0xdb   :  { %v276_v14 = vpop.f32.mrb[0].mxu0 }
  0xdc   :  { %v113_v15 = vadd.f32 %v276_v14, %v28_v13  ;;  %v283_v16 = vpop.f32.mrb[0].mxu1  ;;  %v107_v17 = vpop.f32.mrb[1].mxu0 }
  0xdd   :  { %v218_v18 = vadd.f32 %v283_v16, %v28_v13  ;;  %v108_v19 = vadd.f32 %v107_v17, %v23_v12  ;;  %v212_v20 = vpop.f32.mrb[1].mxu1 }
  0xde   :  { %v117_v21 = vmax.f32 %v113_v15, 0.4  ;;  %v213_v22 = vadd.f32 %v212_v20, %v23_v12 }
  0xdf   :  { %v222_v23 = vmax.f32 %v218_v18, 0.4  ;;  %v116_v24 = vmax.f32 %v108_v19, 0.4 }
  0xe0   :  { %v119_v25 = vmin.f32 %v117_v21, 0.5  ;;  %v221_v26 = vmax.f32 %v213_v22, 0.4 }
  0xe1   :  { %v224_v27 = vmin.f32 %v222_v23, 0.5  ;;  %v118_v28 = vmin.f32 %v116_v24, 0.5 }
  0xe2   :  { %v252_v29 = vadd.f32 -0.5, %v119_v25  ;;  %v223_v30 = vmin.f32 %v221_v26, 0.5 }
  0xe3   :  { %v251_v31 = vadd.f32 -0.5, %v118_v28  ;;  %v259_v33 = vadd.f32 -0.5, %v224_v27 }
  0xe4   :  { %v124_v32 = vmul.f32 1.442695, %v252_v29  ;;  %v258_v34 = vadd.f32 -0.5, %v223_v30 }
  0xe5   :  { %v122_v35 = vmul.f32 1.442695, %v251_v31  ;;  %v229_v37 = vmul.f32 1.442695, %v259_v33 }
  0xe6   :  { %299 = vpow2.f32 %v124_v32  ;;  %v227_v36 = vmul.f32 1.442695, %v258_v34 }
  0xe7   :  { %301 = vpow2.f32 %v122_v35 }
  0xe8   :  { %303 = vpow2.f32 %v227_v36 }
  0xe9   :  { %305 = vpow2.f32 %v229_v37 }
  0xf0   :  { %v300_v38 = vpop.eup %299 }
  0xf1   :  { %v131_v39 = vsel %vm130_vm4, %v300_v38, 0.0  ;;  %v302_v40 = vpop.eup %301 }
  0xf2   :  { %132 = vadd.xlane.f32.xlu1 %v131_v39  ;;  %v304_v41 = vpop.eup %303  ;;  %v127_v43 = vsel %vm126_vm5, %v302_v40, 0.0 }
  0xf3   :  { %v231_v42 = vsel %vm126_vm5, %v304_v41, 0.0  ;;  %v306_v44 = vpop.eup %305 }
  0xf4   :  { %232 = vadd.xlane.f32.xlu0 %v231_v42  ;;  %v234_v45 = vsel %vm130_vm4, %v306_v44, 0.0 }
  0xf6   :  { %128 = vadd.xlane.f32.xlu1 %v127_v43 }
  0xfa   :  { %235 = vadd.xlane.f32.xlu1 %v234_v45 }
 0x17f   :  { %v133_v46 = vpop.xlane.xlu1 %132 }
 0x180   :  { %307 = vrcp.f32 %v133_v46 }
 0x181   :  { %v233_v47 = vpop.xlane.xlu0 %232 }
 0x182   :  { %309 = vrcp.f32 %v233_v47 }
 0x183   :  { %v129_v48 = vpop.xlane.xlu1 %128 }
 0x184   :  { %311 = vrcp.f32 %v129_v48 }
 0x187   :  { %v236_v49 = vpop.xlane.xlu1 %235 }
 0x188   :  { %313 = vrcp.f32 %v236_v49 }
 0x18a   :  { %v308_v50 = vpop.eup %307 }
 0x18b   :  { %v137_v51 = vmul.f32 %v308_v50, %v300_v38 }
 0x18c   :  { %v310_v52 = vpop.eup %309 }
 0x18d   :  { %139 = vst.msk [vmem:[%s400_s3 + $0x8] sm:$0x3] %vm130_vm4, %v137_v51  ;;  %v239_v54 = vmul.f32 %v310_v52, %v304_v41 }
 0x18e   :  { %v312_v53 = vpop.eup %311 }
 0x18f   :  { %v136_v55 = vmul.f32 %v312_v53, %v302_v40  ;;  %260 = vst.msk [vmem:[%s400_s3 + $0x10] sm:$0xff] %vm126_vm5, %v239_v54 }
 0x191   :  { %138 = vst.msk [vmem:[%s400_s3] sm:$0xff] %vm126_vm5, %v136_v55 }
 0x192   :  { %v314_v56 = vpop.eup %313 }
 0x193   :  { %v240_v57 = vmul.f32 %v314_v56, %v306_v44 }
 0x195   :  { %261 = vst.msk [vmem:[%s400_s3 + $0x18] sm:$0x3] %vm130_vm4, %v240_v57 }

</bundles_post_ra>
